<compile_context>
chip_gen: v7x
topology: tpu7x:2x2x1
jax: 0.10.0
libtpu: 0.0.40
codegen_flags: <defaults>
</compile_context>

<pallas_src>
import functools

import jax
import jax.numpy as jnp
from jax.experimental import pallas as pl
from jax.experimental.pallas import tpu as pltpu


# ----------------------------------------------------------------------------
# Kernel: full 3-layer MLP + residual on one batch tile (lane-packed layout).
# ----------------------------------------------------------------------------
def _rtic_kernel(x_ref, w1_ref, w2_ref, w3_ref, c_ref, o_ref, *, ph):
    x = x_ref[...]                                      # (tm, PC), I/O dtype
    wdt = w1_ref.dtype

    t1 = c_ref[0:1, :ph]                                # (1, PH) f32
    t2 = c_ref[1:2, :ph]                                # (1, PH) f32
    b3 = c_ref[2:3, :]                                  # (1, PC) f32

    # Linear(C -> H): BN1 scale folded into the columns of W1, bias into t1.
    h = jnp.dot(x, w1_ref[...], preferred_element_type=jnp.float32)
    h = jnp.maximum(h + t1, 0.0).astype(wdt)            # elementwise in f32

    # Linear(H -> H): BN2 scale folded into W2, bias into t2.
    h = jnp.dot(h, w2_ref[...], preferred_element_type=jnp.float32)
    h = jnp.maximum(h + t2, 0.0).astype(wdt)

    # Linear(H -> C) + bias + residual.
    y = jnp.dot(h, w3_ref[...], preferred_element_type=jnp.float32)
    o_ref[...] = (y + b3 + x.astype(jnp.float32)).astype(o_ref.dtype)


# ----------------------------------------------------------------------------
# One-time parameter packing (outside the hot path).
# ----------------------------------------------------------------------------
def _pack_factor(C):
    """Batch rows packed per 128-lane vreg row (lane-dense layout)."""
    if C < 128 and 128 % C == 0:
        return 128 // C
    return 1


def prepare_params(p, dtype=jnp.bfloat16):
    """Fold BN into the Linears and build lane-packed block-diagonal weights.

    Call once; the result is batch-independent and reusable across calls.
    Folds:  (x @ W + b) * s + t  ==  x @ (W * s) + (b * s + t)
    (numerically equivalent up to f32 rounding order).
    """
    C, H = p["w1"].shape
    P = _pack_factor(C)
    PC, PH = P * C, P * H

    w1 = p["w1"] * p["s1"]                 # BN1 scale into columns of W1
    t1 = p["b1"] * p["s1"] + p["t1"]       # Linear bias into BN1 shift
    w2 = p["w2"] * p["s2"]
    t2 = p["b2"] * p["s2"] + p["t2"]

    eye = jnp.eye(P, dtype=jnp.float32)
    consts = jnp.concatenate(
        [jnp.pad(jnp.tile(t1, (1, P)), ((0, 0), (0, PC - PH))),
         jnp.pad(jnp.tile(t2, (1, P)), ((0, 0), (0, PC - PH))),
         jnp.tile(p["b3"], (1, P))],
        axis=0).astype(jnp.float32)                       # (3, PC)

    return dict(
        w1=jnp.kron(eye, w1).astype(dtype),               # (PC, PH)
        w2=jnp.kron(eye, w2).astype(dtype),               # (PH, PH)
        w3=jnp.kron(eye, p["w3"]).astype(dtype),          # (PH, PC)
        consts=consts,
        P=P, C=int(C), H=int(H),
    )


# ----------------------------------------------------------------------------
# Tiling choice and pallas_call wrapper.
# ----------------------------------------------------------------------------
def _choose_tm(bp):
    """Batch-tile rows (packed rows) for a packed batch of `bp` rows."""
    if bp <= 8:
        return bp                           # one full-extent tile
    # At least 2 grid steps (keeps both v7x TensorCores busy); tiles as large
    # as possible (rows are only 128 lanes wide, so per-step overhead matters);
    # cap keeps double-buffered x + o at a few MiB of VMEM even in f32.
    tm = -(-bp // 2)                        # cdiv(bp, 2)
    tm = ((tm + 7) // 8) * 8                # sublane multiple; partial last
    return min(2048, tm)                    # block is clipped by Pallas


def rtic_error_encoding(x, packed):
    """x: [B, C] float32 or bfloat16; packed: dict from prepare_params()."""
    B, C = x.shape
    P, H = packed["P"], packed["H"]
    assert C == packed["C"], "channel mismatch with packed params"
    PC, PH = P * C, P * H

    # Pad B up to a multiple of P (at most P-1 rows) so the lane packing is a
    # free row-major reshape; this avoids the masked-store P=1 cliff.
    pad_rows = (-B) % P
    if pad_rows:
        x = jnp.pad(x, ((0, pad_rows), (0, 0)))
    Bfull = B + pad_rows
    xp = x.reshape(Bfull // P, PC)
    Bp = xp.shape[0]

    tm = _choose_tm(Bp)
    grid = (pl.cdiv(Bp, tm),)               # partial last block is clipped

    def const_spec(shape):
        return pl.BlockSpec(shape, lambda i: (0,) * len(shape))

    in_specs = [
        pl.BlockSpec((tm, PC), lambda i: (i, 0)),         # x tile (lane-dense)
        const_spec((PC, PH)),                             # W1'
        const_spec((PH, PH)),                             # W2'
        const_spec((PH, PC)),                             # W3
        const_spec((3, PC)),                              # [t1'; t2'; b3]
    ]

    # True model work (kron zero blocks excluded) and real bytes moved.
    wbytes = jnp.dtype(packed["w1"].dtype).itemsize
    xbytes = jnp.dtype(x.dtype).itemsize
    flops = int(2 * Bfull * (C * H + H * H + H * C))
    bytes_accessed = int(
        xbytes * 2 * Bfull * C                            # x in + y out
        + wbytes * (PC * PH + PH * PH + PH * PC)          # weights
        + 4 * 3 * PC)                                     # folded constants

    out = pl.pallas_call(
        functools.partial(_rtic_kernel, ph=PH),
        out_shape=jax.ShapeDtypeStruct((Bp, PC), x.dtype),
        grid_spec=pltpu.PrefetchScalarGridSpec(
            num_scalar_prefetch=0,
            grid=grid,
            in_specs=in_specs,
            out_specs=pl.BlockSpec((tm, PC), lambda i: (i, 0)),
        ),
        compiler_params=pltpu.CompilerParams(
            dimension_semantics=("parallel",),
        ),
        cost_estimate=pl.CostEstimate(
            flops=flops, transcendentals=0, bytes_accessed=bytes_accessed),
    )(xp, packed["w1"], packed["w2"], packed["w3"], packed["consts"])

    out = out.reshape(Bfull, C)
    if pad_rows:
        out = out[:B]
    return out


# ----------------------------------------------------------------------------
# Deterministic synthetic parameters (eval-mode BN folded to scale/shift).
# ----------------------------------------------------------------------------
def init_params(key, C):
    H = C // 2
    ks = jax.random.split(key, 8)
    s_in = 1.0 / jnp.sqrt(C)
    s_h = 1.0 / jnp.sqrt(H)

    # Linear weights stored as [in, out] so the kernel computes x @ W + b.
    w1 = jax.random.uniform(ks[0], (C, H), jnp.float32, -s_in, s_in)
    b1 = jax.random.uniform(ks[1], (1, H), jnp.float32, -s_in, s_in)
    w2 = jax.random.uniform(ks[2], (H, H), jnp.float32, -s_h, s_h)
    b2 = jax.random.uniform(ks[3], (1, H), jnp.float32, -s_h, s_h)
    w3 = jax.random.uniform(ks[4], (H, C), jnp.float32, -s_h, s_h)
    b3 = jax.random.uniform(ks[5], (1, C), jnp.float32, -s_h, s_h)

    # BatchNorm1d (eval): y = gamma*(h-mean)/sqrt(var+eps)+beta == h*s + t
    eps = 1e-5

    def bn(k):
        km, kg, kb = jax.random.split(k, 3)
        mean = 0.1 * jax.random.normal(km, (1, H), jnp.float32)
        var = jnp.ones((1, H), jnp.float32)
        gamma = jax.random.uniform(kg, (1, H), jnp.float32, 0.5, 1.5)
        beta = 0.1 * jax.random.normal(kb, (1, H), jnp.float32)
        s = gamma / jnp.sqrt(var + eps)
        t = beta - mean * s
        return s, t

    s1, t1 = bn(ks[6])
    s2, t2 = bn(ks[7])
    return dict(w1=w1, b1=b1, s1=s1, t1=t1,
                w2=w2, b2=b2, s2=s2, t2=t2,
                w3=w3, b3=b3)


def rtic_ref(x, p):
    """Pure-JAX reference of the same forward pass (unpacked params, f32)."""
    h = jnp.maximum((x @ p["w1"] + p["b1"]) * p["s1"] + p["t1"], 0.0)
    h = jnp.maximum((h @ p["w2"] + p["b2"]) * p["s2"] + p["t2"], 0.0)
    return h @ p["w3"] + p["b3"] + x


if __name__ == "__main__":
    key = jax.random.PRNGKey(0)
    kp, kx1, kx2, kx3 = jax.random.split(key, 4)

    C = 32                                    # in_c_img = 32 (hidden = 16)
    raw = init_params(kp, C)

    # 1) Exact-semantics check: f32 I/O + f32 packed weights, tight tolerance.
    #    Exercises lane packing (P=4), (8,128) tiles and a 2-step grid.
    packed_f32 = prepare_params(raw, dtype=jnp.float32)
    B = 64
    x = jax.random.normal(kx1, (B, C), jnp.float32)
    out = jax.block_until_ready(rtic_error_encoding(x, packed_f32))
    ref = rtic_ref(x, raw)
    assert out.shape == (B, C) and out.dtype == jnp.float32
    assert jnp.allclose(out, ref, atol=1e-4, rtol=1e-4), "mismatch (f32, B=64)"

    # 2) Tiny-batch path: single full-extent tile, no padding.
    x3 = jax.random.normal(kx3, (8, C), jnp.float32)
    out3 = jax.block_until_ready(rtic_error_encoding(x3, packed_f32))
    assert jnp.allclose(out3, rtic_ref(x3, raw), atol=1e-4, rtol=1e-4), \
        "mismatch (f32, B=8)"

    # 3) Perf configuration: bf16 I/O, ragged batch (exercises the pad-to-P
    #    path and the clipped partial last grid block).
    packed_bf16 = prepare_params(raw, dtype=jnp.bfloat16)
    B2 = 50
    x2 = jax.random.normal(kx2, (B2, C), jnp.float32).astype(jnp.bfloat16)
    out2 = jax.block_until_ready(rtic_error_encoding(x2, packed_bf16))
    ref2 = rtic_ref(x2.astype(jnp.float32), raw)
    assert out2.shape == (B2, C) and out2.dtype == jnp.bfloat16
    assert jnp.allclose(out2.astype(jnp.float32), ref2, atol=6e-2, rtol=6e-2), \
        "mismatch (bf16, B=50)"

    print("KERNEL_OK")
</pallas_src>

<mosaic_0001>
module attributes {stable_mosaic.version = 11 : i64} {
  func.func @_rtic_kernel(%arg0: i32, %arg1: memref<8x128xf32, #tpu.memory_space<vmem>>, %arg2: memref<128x64xf32, #tpu.memory_space<vmem>>, %arg3: memref<64x64xf32, #tpu.memory_space<vmem>>, %arg4: memref<64x128xf32, #tpu.memory_space<vmem>>, %arg5: memref<3x128xf32, #tpu.memory_space<vmem>>, %arg6: memref<8x128xf32, #tpu.memory_space<vmem>>) attributes {dimension_semantics = [#tpu.dimension_semantics<parallel>], iteration_bounds = array<i64: 2>, scalar_prefetch = 0 : i64, scratch_operands = 0 : i64, tpu.core_type = #tpu.core_type<tc>, window_params = [{transform_indices = @transform_0, window_bounds = array<i64: 8, 128>}, {pipeline_mode = #tpu.pipeline_mode<synchronous>, transform_indices = @transform_1, window_bounds = array<i64: 128, 64>}, {pipeline_mode = #tpu.pipeline_mode<synchronous>, transform_indices = @transform_2, window_bounds = array<i64: 64, 64>}, {pipeline_mode = #tpu.pipeline_mode<synchronous>, transform_indices = @transform_3, window_bounds = array<i64: 64, 128>}, {pipeline_mode = #tpu.pipeline_mode<synchronous>, transform_indices = @transform_4, window_bounds = array<i64: 3, 128>}, {transform_indices = @transform_5, window_bounds = array<i64: 8, 128>}]} {
    %c0 = arith.constant 0 : index
    %c0_0 = arith.constant 0 : index
    %0 = vector.load %arg1[%c0, %c0_0] : memref<8x128xf32, #tpu.memory_space<vmem>>, vector<8x128xf32>
    %c0_1 = arith.constant 0 : index
    %c0_2 = arith.constant 0 : index
    %1 = vector.load %arg5[%c0_1, %c0_2] : memref<3x128xf32, #tpu.memory_space<vmem>>, vector<1x64xf32>
    %c1 = arith.constant 1 : index
    %c0_3 = arith.constant 0 : index
    %2 = vector.load %arg5[%c1, %c0_3] : memref<3x128xf32, #tpu.memory_space<vmem>>, vector<1x64xf32>
    %c2 = arith.constant 2 : index
    %c0_4 = arith.constant 0 : index
    %3 = vector.load %arg5[%c2, %c0_4] : memref<3x128xf32, #tpu.memory_space<vmem>>, vector<1x128xf32>
    %c0_5 = arith.constant 0 : index
    %c0_6 = arith.constant 0 : index
    %4 = vector.load %arg2[%c0_5, %c0_6] : memref<128x64xf32, #tpu.memory_space<vmem>>, vector<128x64xf32>
    %cst = arith.constant dense<0.000000e+00> : vector<8x64xf32>
    %5 = tpu.matmul %0, %4, %cst {dimension_numbers = #tpu.dot_dimension_numbers<[1], [0], [0], [1], [0, 0, 1, 1], [], []>} : vector<8x128xf32>, vector<128x64xf32>, vector<8x64xf32> -> vector<8x64xf32>
    %6 = vector.broadcast %1 : vector<1x64xf32> to vector<8x64xf32>
    %7 = arith.addf %5, %6 : vector<8x64xf32>
    %cst_7 = arith.constant 0.000000e+00 : f32
    %8 = vector.broadcast %cst_7 : f32 to vector<8x64xf32>
    %9 = arith.maximumf %7, %8 : vector<8x64xf32>
    %c0_8 = arith.constant 0 : index
    %c0_9 = arith.constant 0 : index
    %10 = vector.load %arg3[%c0_8, %c0_9] : memref<64x64xf32, #tpu.memory_space<vmem>>, vector<64x64xf32>
    %cst_10 = arith.constant dense<0.000000e+00> : vector<8x64xf32>
    %11 = tpu.matmul %9, %10, %cst_10 {dimension_numbers = #tpu.dot_dimension_numbers<[1], [0], [0], [1], [0, 0, 1, 1], [], []>} : vector<8x64xf32>, vector<64x64xf32>, vector<8x64xf32> -> vector<8x64xf32>
    %12 = vector.broadcast %2 : vector<1x64xf32> to vector<8x64xf32>
    %13 = arith.addf %11, %12 : vector<8x64xf32>
    %cst_11 = arith.constant 0.000000e+00 : f32
    %14 = vector.broadcast %cst_11 : f32 to vector<8x64xf32>
    %15 = arith.maximumf %13, %14 : vector<8x64xf32>
    %c0_12 = arith.constant 0 : index
    %c0_13 = arith.constant 0 : index
    %16 = vector.load %arg4[%c0_12, %c0_13] : memref<64x128xf32, #tpu.memory_space<vmem>>, vector<64x128xf32>
    %cst_14 = arith.constant dense<0.000000e+00> : vector<8x128xf32>
    %17 = tpu.matmul %15, %16, %cst_14 {dimension_numbers = #tpu.dot_dimension_numbers<[1], [0], [0], [1], [0, 0, 1, 1], [], []>} : vector<8x64xf32>, vector<64x128xf32>, vector<8x128xf32> -> vector<8x128xf32>
    %18 = vector.broadcast %3 : vector<1x128xf32> to vector<8x128xf32>
    %19 = arith.addf %17, %18 : vector<8x128xf32>
    %20 = arith.addf %19, %0 : vector<8x128xf32>
    %c0_15 = arith.constant 0 : index
    %c0_16 = arith.constant 0 : index
    %21 = vector.load %arg6[%c0_15, %c0_16] : memref<8x128xf32, #tpu.memory_space<vmem>>, vector<8x128xf32>
    tpu.vector_store %arg6[%c0_15, %c0_16], %20 {strides = array<i32>} : memref<8x128xf32, #tpu.memory_space<vmem>>, vector<8x128xf32>,
    return
  }
  func.func @transform_0(%arg0: i32) -> (i32, i32) {
    %c0_i32 = arith.constant 0 : i32
    %c0_i32_0 = arith.constant 0 : i32
    return %arg0, %c0_i32 : i32, i32
  }
  func.func @transform_1(%arg0: i32) -> (i32, i32) {
    %c0_i32 = arith.constant 0 : i32
    %c0_i32_0 = arith.constant 0 : i32
    %c0_i32_1 = arith.constant 0 : i32
    return %c0_i32, %c0_i32_0 : i32, i32
  }
  func.func @transform_2(%arg0: i32) -> (i32, i32) {
    %c0_i32 = arith.constant 0 : i32
    %c0_i32_0 = arith.constant 0 : i32
    %c0_i32_1 = arith.constant 0 : i32
    return %c0_i32, %c0_i32_0 : i32, i32
  }
  func.func @transform_3(%arg0: i32) -> (i32, i32) {
    %c0_i32 = arith.constant 0 : i32
    %c0_i32_0 = arith.constant 0 : i32
    %c0_i32_1 = arith.constant 0 : i32
    return %c0_i32, %c0_i32_0 : i32, i32
  }
  func.func @transform_4(%arg0: i32) -> (i32, i32) {
    %c0_i32 = arith.constant 0 : i32
    %c0_i32_0 = arith.constant 0 : i32
    %c0_i32_1 = arith.constant 0 : i32
    return %c0_i32, %c0_i32_0 : i32, i32
  }
  func.func @transform_5(%arg0: i32) -> (i32, i32) {
    %c0_i32 = arith.constant 0 : i32
    %c0_i32_0 = arith.constant 0 : i32
    return %arg0, %c0_i32 : i32, i32
  }
}

</mosaic_0001>

<bundles_post_ra>
// kernel: tpu_custom_call.1
= control target key start
LH: loop header
LB: loop body
LE: loop exit
PB: predicated region body
PF: predicated region fallthrough
CT: control target
= control target key end

     0   :  { %10 = vsyncpa [#allocation3], 0  ;;  %s1102_s0 = inlined_call_operand.vmem [shape: f32[16,128], index: 0, kind: input, shape index: {}]   ;;  %s1103_s1 = inlined_call_operand.vmem [shape: f32[128,64], index: 1, kind: input, shape index: {}]   ;;  %s1104_s2 = inlined_call_operand.vmem [shape: f32[64,64], index: 2, kind: input, shape index: {}]   ;;  %s1105_s3 = inlined_call_operand.vmem [shape: f32[64,128], index: 3, kind: input, shape index: {}]   ;;  %s1106_s4 = inlined_call_operand.vmem [shape: f32[3,128], index: 4, kind: input, shape index: {}]   ;;  %s1107_s5 = inlined_call_operand.hbm [shape: f32[16,128], index: 5, kind: output, shape index: {}]  }
   0x1   :  { %12 = vsyncpa [#allocation3 + $0x1], 0  ;;  %s873_s18 = smov 0   ;;  %s875_s19 = smov 0  }
   0x2   :  { %s877_s20 = smov 0   ;;  %s879_s21 = smov 0  }
   0x3 LB: > { %s894_s22 = sadd.s32 4294967295, %s837_s21   ;;  %s562_s23 = sadd.s32 4294967294, %s837_s21   ;;  %s837_s21 = sphi %s879_s21, %s1113_s21   ;;  %s833_s20 = sphi %s877_s20, %s1112_s20   ;;  %s829_s19 = sphi %s875_s19, %s1111_s19   ;;  %s825_s18 = sphi %s873_s18, %s1110_s18  }
   0x4   : > { %s898_s24 = sadd.s32 1, %s837_s21   ;;  %s135_s25 = sadd.s32 1, %s833_s20 }
   0x5   : > { %s132_s26 = ssub.s32 %s837_s21, %s898_s24  ;;  %p145_p0 = scmp.ne.s32.totalorder %s833_s20, %s829_s19 }
   0x6   : > { %p133_p1 = scmp.eq.s32.totalorder %s132_s26, 0  ;;  %p146_p2 = scmp.eq.s32.totalorder %s894_s22, 1 }
   0x7   : > { %p151_p3 = scmp.ne.s32.totalorder %s829_s19, %s825_s18  ;;  %p152_p4 = scmp.eq.s32.totalorder %s562_s23, 1 }
   0x8   : > { %s909_s27 = scalar_select %p133_p1, %s833_s20, %s135_s25  }
   0x9   : > { %p911_p5 = por %p146_p2, %p145_p0  ;;  %p915_p6 = por %p152_p4, %p151_p3 }
   0xa   : > { %p565_p7 = scmp.ge.s32.totalorder %s837_s21, 1  ;;  %p189_p8 = scmp.lt.s32.totalorder %s837_s21, 3 }
   0xc   : > { %p190_p9 = pnand %p565_p7, %p189_p8 }
   0xd   : > { %v224_v0 = vld [vmem:[%s1103_s1] sm:$0xff] (!%p190_p9)  ;;  %v225_v1 = vld [vmem:[%s1103_s1 + $0x8] sm:$0xff] (!%p190_p9)  ;;  %v226_v2 = vld [vmem:[%s1103_s1 + $0x10] sm:$0xff] (!%p190_p9)  ;;  %v839_v3 = vmov (!%p190_p9), 0.0|0.0   ;;  %vm840_vm0 = vmmov (!%p190_p9), 0   ;;  %v841_v6 = vmov (!%p190_p9), 0.0  }
   0xe   : > { %193 = sbr.rel (%p190_p9) target bundleno = 709 (0x2c5), region = 40  ;;  %685 = vmatprep.subr.bf16.mxu0 (!%p190_p9), %v839_v3  ;;  %v686_v4 = vpack.c.bf16 (!%p190_p9), %v225_v1, %v224_v0  ;;  %v227_v5 = vld [vmem:[%s1103_s1 + $0x18] sm:$0xff] (!%p190_p9)  ;;  %644 = vmatprep.mubr.msk.f32.mxu0 (!%p190_p9), %vm840_vm0, %v841_v6  ;;  %v228_v8 = vld [vmem:[%s1103_s1 + $0x20] sm:$0xff] (!%p190_p9)  ;;  %v229_v9 = vld [vmem:[%s1103_s1 + $0x28] sm:$0xff] (!%p190_p9)  ;;  %p216_p10 = scmp.lt.s32.totalorder (!%p190_p9), %s894_s22, 1  ;;  %vm327_vm1 = vcmask (!%p190_p9), 523264  }
   0xf   : > { %709 = vmatprep.subr.bf16.mxu1 (!%p190_p9), %v839_v3  ;;  %663 = vmatprep.mubr.msk.f32.mxu1 (!%p190_p9), %vm840_vm0, %v841_v6  ;;  %v689_v7 = vpack.c.bf16 (!%p190_p9), %v227_v5, %v226_v2  ;;  %v315_v10 = vld [vmem:[%s1104_s2] sm:$0xff] (!%p190_p9)  ;;  %v316_v11 = vld [vmem:[%s1104_s2 + $0x8] sm:$0xff] (!%p190_p9)  ;;  %v317_v13 = vld [vmem:[%s1104_s2 + $0x10] sm:$0xff] (!%p190_p9)  ;;  %v692_v15 = vpack.c.bf16 (!%p190_p9), %v229_v9, %v228_v8  ;;  %s213_s14 = sand.u32 (!%p190_p9), 1, %s829_s19  }
  0x10   : > { %687 = vmatpush3.bf16.msra.mxu0 (!%p190_p9), %v686_v4  ;;  %v710_v12 = vpack.c.bf16 (!%p190_p9), %v316_v11, %v315_v10  ;;  %v318_v14 = vld [vmem:[%s1104_s2 + $0x18] sm:$0xff] (!%p190_p9)  ;;  %v230_v16 = vld [vmem:[%s1103_s1 + $0x30] sm:$0xff] (!%p190_p9)  ;;  %v319_v19 = vld [vmem:[%s1104_s2 + $0x20] sm:$0xff] (!%p190_p9)  ;;  %s566_s15 = sshll.u32 (!%p190_p9), %s213_s14, 3  ;;  %s490_s8 = scalar_lea.sflag (!%p190_p9), [#allocation3], %s213_s14 }
  0x11   : > { %688 = vmatprep.subr.bf16.mxu0 (!%p190_p9), %v839_v3  ;;  %v231_v17 = vld [vmem:[%s1103_s1 + $0x38] sm:$0xff] (!%p190_p9)  ;;  %v713_v18 = vpack.c.bf16 (!%p190_p9), %v318_v14, %v317_v13  ;;  %v320_v20 = vld [vmem:[%s1104_s2 + $0x28] sm:$0xff] (!%p190_p9)  ;;  %v232_v22 = vld [vmem:[%s1103_s1 + $0x40] sm:$0xff] (!%p190_p9)  ;;  %s215_s25 = scalar_lea.vmem (!%p190_p9), [#allocation2], %s566_s15 }
  0x12   : > { %711 = vmatpush3.bf16.msra.mxu1 (!%p190_p9), %v710_v12  ;;  %v695_v21 = vpack.c.bf16 (!%p190_p9), %v231_v17, %v230_v16  ;;  %v233_v23 = vld [vmem:[%s1103_s1 + $0x48] sm:$0xff] (!%p190_p9)  ;;  %v716_v24 = vpack.c.bf16 (!%p190_p9), %v320_v20, %v319_v19  ;;  %v234_v26 = vld [vmem:[%s1103_s1 + $0x50] sm:$0xff] (!%p190_p9)  ;;  %v235_v27 = vld [vmem:[%s1103_s1 + $0x58] sm:$0xff] (!%p190_p9)  ;;  %s503_s26 = sshll.u32 (!%p190_p9), %s215_s25, 4  ;;  %s1062_s26 = int_to_ptr.vmem [resolvable:$true] %s503_s26 }
  0x13   : > { %712 = vmatprep.subr.bf16.mxu1 (!%p190_p9), %v839_v3  ;;  %v698_v25 = vpack.c.bf16 (!%p190_p9), %v233_v23, %v232_v22  ;;  %v701_v28 = vpack.c.bf16 (!%p190_p9), %v235_v27, %v234_v26  ;;  %v236_v29 = vld [vmem:[%s1103_s1 + $0x60] sm:$0xff] (!%p190_p9)  ;;  %v237_v30 = vld [vmem:[%s1103_s1 + $0x68] sm:$0xff] (!%p190_p9)  ;;  %v238_v32 = vld [vmem:[%s1103_s1 + $0x70] sm:$0xff] (!%p190_p9)  ;;  %s775_s9 = scalar_lea.vmem (!%p190_p9), %s1062_s26, 128 }
  0x14   : > { %690 = vmatpush3.bf16.msra.mxu0 (!%p190_p9), %v689_v7  ;;  %v704_v31 = vpack.c.bf16 (!%p190_p9), %v237_v30, %v236_v29  ;;  %v239_v33 = vld [vmem:[%s1103_s1 + $0x78] sm:$0xff] (!%p190_p9)  ;;  %v321_v36 = vld [vmem:[%s1104_s2 + $0x30] sm:$0xff] (!%p190_p9)  ;;  %v568_v39 = vld [vmem:[%s1106_s4] ss:$0 sm:$0xff] (!%p190_p9)  ;;  %p776_p11 = scmp.ne.s32.totalorder (!%p190_p9), %s1062_s26, %s775_s9 }
  0x15   : > { %691 = vmatprep.subr.bf16.mxu0 %v839_v3  ;;  %s217_s13 = scalar_select %p216_p10, %s894_s22, 1  ;;  %v707_v34 = vpack.c.bf16 %v239_v33, %v238_v32  ;;  %v322_v37 = vld [vmem:[%s1104_s2 + $0x38] sm:$0xff]  ;;  %v402_v40 = vld [vmem:[%s1105_s3] sm:$0xff]  ;;  %v403_v41 = vld [vmem:[%s1105_s3 + $0x8] sm:$0xff] }
  0x16   : > { %714 = vmatpush3.bf16.msra.mxu1 %v713_v18  ;;  %v719_v38 = vpack.c.bf16 %v322_v37, %v321_v36  ;;  %v722_v45 = vpack.c.bf16 %v403_v41, %v402_v40  ;;  %v404_v47 = vld [vmem:[%s1105_s3 + $0x10] sm:$0xff]  ;;  %v405_v48 = vld [vmem:[%s1105_s3 + $0x18] sm:$0xff]  ;;  %v406_v50 = vld [vmem:[%s1105_s3 + $0x20] sm:$0xff]  ;;  %p777_p12 = pnand %p776_p11, %p911_p5 }
  0x17   : > { %715 = vmatprep.subr.bf16.mxu1 %v839_v3  ;;  %s567_s23 = sshll.u32 %s217_s13, 3  ;;  %v725_v49 = vpack.c.bf16 %v405_v48, %v404_v47  ;;  %v407_v51 = vld [vmem:[%s1105_s3 + $0x28] sm:$0xff]  ;;  %v408_v53 = vld [vmem:[%s1105_s3 + $0x30] sm:$0xff]  ;;  %v409_v54 = vld [vmem:[%s1105_s3 + $0x38] sm:$0xff] }
  0x18   : > { %693 = vmatpush3.bf16.msra.mxu0 %v692_v15  ;;  %s219_s30 = scalar_lea.vmem %s1102_s0, %s567_s23  ;;  %v728_v52 = vpack.c.bf16 %v407_v51, %v406_v50  ;;  %v731_v55 = vpack.c.bf16 %v409_v54, %v408_v53  ;;  %v569_v56 = vld [vmem:[%s1106_s4 + $0x1] ss:$0 sm:$0xff]  ;;  %v571_v61 = vld [vmem:[%s1106_s4 + $0x2] ss:$0 sm:$0xff]  ;;  %s574_s23 = sshll.u32 %s894_s22, 7 }
  0x19   : > { %694 = vmatprep.subr.bf16.mxu0 %v839_v3  ;;  %v220_v35 = vld [vmem:[%s219_s30] sm:$0xff]  ;;  %s1060_s7 = scalar_lea.hbm %s1107_s5, %s574_s23  ;;  %p778_p13 = pneg %p777_p12 }
  0x1a   : > { %717 = vmatpush3.bf16.msra.mxu1 %v716_v24  ;;  %s842_s22 = smov [#allocation2]  }
  0x1b   : > { %718 = vmatprep.subr.bf16.mxu1 %v839_v3  ;;  %s779_s10 = sshll.u32 %s842_s22, 4  ;;  %s780_s10 = int_to_ptr.vmem [resolvable:$false] %s779_s10 }
  0x1c   : > { %696 = vmatpush3.bf16.msra.mxu0 %v695_v21  ;;  %s781_s11 = scalar_lea.vmem %s780_s10, 256  ;;  %p782_p0 = scmp.lt.s32.totalorder %s1062_s26, %s780_s10 }
  0x1d   : > { %697 = vmatprep.subr.bf16.mxu0 %v839_v3  ;;  %p783_p1 = scmp.lt.s32.totalorder %s781_s11, %s775_s9 }
  0x1e   : > { %720 = vmatpush3.bf16.msra.mxu1 %v719_v38 }
  0x1f   : > { %721 = vmatprep.subr.bf16.mxu1 %v839_v3  ;;  %p784_p2 = por %p783_p1, %p782_p0 }
  0x20   : > { %699 = vmatpush3.bf16.msra.mxu0 %v698_v25 }
  0x21   : > { %700 = vmatprep.subr.bf16.mxu0 %v839_v3  ;;  %p785_p3 = pnand %p784_p2, %p778_p13 }
  0x24   : > { %702 = vmatpush3.bf16.msra.mxu0 %v701_v28 }
  0x25   : > { %703 = vmatprep.subr.bf16.mxu0 %v839_v3 }
  0x28   : > { %705 = vmatpush3.bf16.msra.mxu0 %v704_v31 }
  0x29   : > { %706 = vmatprep.subr.bf16.mxu0 %v839_v3 }
  0x2c   : > { %708 = vmatpush3.bf16.msra.mxu0 %v707_v34 }
  0x2f   : > { %645 = vmatmul.mubr.f32.vlgmr.msra.gmra.mrb[0].mxu0 %v220_v35 }
 0x102   : > { %v310_v42 = vpop.f32.mrb[0].mxu0 }
 0x103   : > { %v311_v43 = vadd.f32 %v568_v39, %v310_v42  ;;  %v646_v44 = vpop.f32.mrb[1].mxu0 }
 0x105   : > { %v314_v46 = vmax.f32 %v311_v43, 0.0 }
 0x107   : > { %664 = vmatmul.mubr.msk.f32.vlgmr.msra.gmra.mrb[0].mxu1 %vm327_vm1, %v314_v46 }
 0x108   : > { %723 = vmatpush3.bf16.msra.mxu1 %v722_v45  ;;  %682 = vmatprep.mubr.msk.f32.mxu1 %vm840_vm0, %v841_v6 }
 0x109   : > { %724 = vmatprep.subr.bf16.mxu1 %v839_v3 }
 0x10c   : > { %726 = vmatpush3.bf16.msra.mxu1 %v725_v49 }
 0x10d   : > { %727 = vmatprep.subr.bf16.mxu1 %v839_v3 }
 0x110   : > { %729 = vmatpush3.bf16.msra.mxu1 %v728_v52 }
 0x111   : > { %730 = vmatprep.subr.bf16.mxu1 %v839_v3 }
 0x114   : > { %732 = vmatpush3.bf16.msra.mxu1 %v731_v55 }
 0x1da   : > { %v397_v57 = vpop.f32.mrb[0].mxu1 }
 0x1db   : > { %v398_v58 = vadd.f32 %v569_v56, %v397_v57  ;;  %v665_v59 = vpop.f32.mrb[1].mxu1 }
 0x1dd   : > { %v401_v60 = vmax.f32 %v398_v58, 0.0 }
 0x1df   : > { %683 = vmatmul.mubr.msk.f32.vlgmr.msra.gmra.mrb[2].mxu1 %vm327_vm1, %v401_v60 }
 0x2b2   : > { %v483_v62 = vpop.f32.mrb[2].mxu1 }
 0x2b3   : > { %v484_v63 = vadd.f32 %v571_v61, %v483_v62  ;;  %v684_v0 = vpop.f32.mrb[3].mxu1 }
 0x2b5   : > { %v487_v1 = vadd.f32 %v484_v63, %v220_v35 }
 0x2b7   : > { %488 = vst [vmem:[%s215_s25] sm:$0xff] %v487_v1 }
 0x2b8   : > { %788 = shalt.err (!%p785_p3)
}
 0x2b9   : > { %s789_s12 = scalar_lea.hbm %s1060_s7, 128  ;;  %s793_s15 = scalar_lea.hbm %s1107_s5, 256 }
 0x2ba   : > { %p790_p4 = scmp.ne.s32.totalorder %s1060_s7, %s789_s12  ;;  %p794_p9 = scmp.lt.u32.totalorder %s1060_s7, %s1107_s5 }
 0x2bb   : > { %p795_p10 = scmp.lt.u32.totalorder %s793_s15, %s789_s12  ;;  %p797_p12 = scmp.lt.u32.totalorder %s789_s12, %s1060_s7 }
 0x2bc   : > { %p791_p7 = pnand %p790_p4, %p911_p5 }
 0x2bd   : > { %p796_p11 = por %p795_p10, %p794_p9 }
 0x2be   : > { %p792_p8 = pneg %p791_p7 }
 0x2bf   : > { %p798_p13 = por %p797_p12, %p796_p11 }
 0x2c1   : > { %p799_p0 = pnand %p798_p13, %p792_p8 }
 0x2c3   : > { %802 = shalt.err (!%p799_p0)
}
 0x2c4   : > { %733 = dma.vmem_to_hbm [thread:$0]  (%p911_p5), %s1062_s26, 128, %s1060_s7, %s490_s8  }
 0x2c5 PF: > { %p739_p1 = scmp.ge.s32.totalorder %s837_s21, 2  ;;  %s515_s23 = sand.u32 1, %s825_s18  }
 0x2c6   : > { %s516_s25 = scalar_lea.sflag [#allocation3], %s515_s23 }
 0x2c7   : > { %p736_p2 = pnand %p739_p1, %p915_p6 }
 0x2c9   : > { %820 = dma.done.wait (!%p736_p2), %s516_s25, 128  }
 0x2ca   : > { %822 = vsyncadd (!%p736_p2), %s516_s25, 4294967168  ;;  %p15_p3 = scmp.ge.s32.totalorder %s898_s24, 4   ;;  %s1110_s18 = smov %s829_s19 }
 0x2cb   : > { %s1111_s19 = smov %s833_s20  ;;  %s1112_s20 = smov %s909_s27 }
 0x2cc   : > { %s1113_s21 = smov %s898_s24  ;;  %17 = sbr.rel (!%p15_p3) target bundleno = 3 (0x3), region = 75 }
 0x2d3   :  { %521 = vsyncpa [#allocation3], 1 }
 0x2d4   :  { %523 = vsyncpa [#allocation3 + $0x1], 1 }

</bundles_post_ra>
